<compile_context>
chip_gen: v7x
topology: tpu7x:2x2x1
jax: 0.10.0
libtpu: 0.0.40
codegen_flags: <defaults>
</compile_context>

<pallas_src>
import math

import jax
import jax.numpy as jnp
from jax.experimental import pallas as pl
from jax.experimental.pallas import tpu as pltpu

MAX_LEN = 50  # PositionalEncoding default


# ----------------------------------------------------------------------------
# Pallas kernel: fused positional-encoding add (lane-dense 2D layout)
# ----------------------------------------------------------------------------

def _pe_add_kernel(x_ref, pe_ref, o_ref):
    # x: (rows, B*E), pe: (rows, B*E) -> plain VPU add, no broadcast temp.
    o_ref[...] = x_ref[...] + pe_ref[...]


# ----------------------------------------------------------------------------
# Buffer construction (init-time, mirrors _get_positional_encoding)
# ----------------------------------------------------------------------------

def make_positional_encoding(d_model, max_len=MAX_LEN):
    """Builds the pe buffer exactly as PositionalEncoding._get_positional_encoding."""
    position = jnp.arange(0, max_len, dtype=jnp.float32)[:, None]
    div_term = jnp.exp(jnp.arange(0, d_model, 2, dtype=jnp.float32) *
                       (-math.log(10000.0) / d_model))
    pe = jnp.zeros((max_len, d_model), jnp.float32)
    pe = pe.at[:, 0::2].set(jnp.sin(position * div_term))
    pe = pe.at[:, 1::2].set(jnp.cos(position * div_term))
    return pe[:, None, :]  # (max_len, 1, d_model), same as the PyTorch buffer


def tile_pe_for_batch(pe, batch):
    """Init-time: (max_len, 1, d_model) -> lane-dense (max_len, batch*d_model).

    Tiling is b-major / e-minor, i.e. [pe_row, pe_row, ...], which matches
    x.reshape(S, B*E) element order exactly.
    """
    pe2 = pe[:, 0, :]                    # (max_len, d_model)
    return jnp.tile(pe2, (1, batch))     # (max_len, batch * d_model)


# ----------------------------------------------------------------------------
# Forward
# ----------------------------------------------------------------------------

def _choose_row_block(n_rows, n_cols, itemsize):
    """Largest row block that keeps (x + pe + out) x double-buffering well under
    a conservative VMEM budget (safe on v7x's 64 MiB / 32 MiB scoped)."""
    target_bytes = 4 << 20  # per-buffer slab target
    rows = target_bytes // max(1, n_cols * itemsize)
    if rows >= n_rows:
        return n_rows                    # whole array: single block
    return max(8, (int(rows) // 8) * 8)  # multiple of 8 sublanes


def positional_encoding_forward(x, pe_tiled):
    """x: (S, B, E) sequence-first, S == max_len.  pe_tiled: (max_len, B*E)."""
    S, B, E = x.shape
    max_len, C = pe_tiled.shape
    # The PyTorch add `x + pe[:, :x.size(1), :]` only broadcasts when
    # S == max_len (the dim-1 slice is over a size-1 axis -> no-op for B >= 1).
    # TODO(synk): conventional intent is probably pe[:x.size(0)]; this mirrors
    # the module as written.
    assert S == max_len, (
        f"PositionalEncoding broadcast requires S == max_len ({max_len}); got S={S}")
    assert C == B * E, (C, B, E)

    x2 = x.reshape(S, C)                          # lane-dense (S, B*E) slab
    pe2 = pe_tiled.astype(x.dtype)                # move bf16 bytes if model is bf16

    row_block = _choose_row_block(S, C, x.dtype.itemsize)
    grid = (pl.cdiv(S, row_block),)
    spec = pl.BlockSpec((row_block, C), lambda i: (i, 0))

    out2 = pl.pallas_call(
        _pe_add_kernel,
        out_shape=jax.ShapeDtypeStruct((S, C), x.dtype),
        grid=grid,
        in_specs=[spec, spec],
        out_specs=spec,
        input_output_aliases={0: 0},              # in-place: output overwrites x
        compiler_params=pltpu.CompilerParams(
            dimension_semantics=("parallel",),    # shard rows across v7x's 2 TCs
            vmem_limit_bytes=64 << 20),
    )(x2, pe2)
    return out2.reshape(S, B, E)


if __name__ == "__main__":
    d_model = 32
    B = 4
    S = MAX_LEN  # must equal max_len=50 for the PyTorch broadcast to hold

    key = jax.random.PRNGKey(0)
    x = jax.random.normal(key, (S, B, d_model), jnp.float32)

    # register_buffer semantics: pe (and its lane-dense tiled copy) built once.
    pe = make_positional_encoding(d_model, MAX_LEN)
    pe_tiled = tile_pe_for_batch(pe, B)

    fwd = jax.jit(positional_encoding_forward)
    out = jax.block_until_ready(fwd(x, pe_tiled))

    # Correctness check against a plain-JAX reference of the PyTorch forward.
    ref = x + pe[:, : x.shape[1], :]
    assert out.shape == (S, B, d_model), out.shape
    assert bool(jnp.all(jnp.isfinite(out)))
    assert bool(jnp.allclose(out, ref, atol=1e-6, rtol=1e-6))
    print("KERNEL_OK")
</pallas_src>

<mosaic_0001>
module attributes {stable_mosaic.version = 11 : i64} {
  func.func @_pe_add_kernel(%arg0: i32, %arg1: memref<50x128xf32, #tpu.memory_space<vmem>>, %arg2: memref<50x128xf32, #tpu.memory_space<vmem>>, %arg3: memref<50x128xf32, #tpu.memory_space<vmem>>) attributes {dimension_semantics = [#tpu.dimension_semantics<parallel>], iteration_bounds = array<i64: 1>, scalar_prefetch = 0 : i64, scratch_operands = 0 : i64, tpu.core_type = #tpu.core_type<tc>, window_params = [{transform_indices = @transform_0, window_bounds = array<i64: 50, 128>}, {transform_indices = @transform_1, window_bounds = array<i64: 50, 128>}, {transform_indices = @transform_2, window_bounds = array<i64: 50, 128>}]} {
    %c0 = arith.constant 0 : index
    %c0_0 = arith.constant 0 : index
    %0 = vector.load %arg1[%c0, %c0_0] : memref<50x128xf32, #tpu.memory_space<vmem>>, vector<50x128xf32>
    %c0_1 = arith.constant 0 : index
    %c0_2 = arith.constant 0 : index
    %1 = vector.load %arg2[%c0_1, %c0_2] : memref<50x128xf32, #tpu.memory_space<vmem>>, vector<50x128xf32>
    %2 = arith.addf %0, %1 : vector<50x128xf32>
    %c0_3 = arith.constant 0 : index
    %c0_4 = arith.constant 0 : index
    %3 = vector.load %arg3[%c0_3, %c0_4] : memref<50x128xf32, #tpu.memory_space<vmem>>, vector<50x128xf32>
    tpu.vector_store %arg3[%c0_3, %c0_4], %2 {strides = array<i32>} : memref<50x128xf32, #tpu.memory_space<vmem>>, vector<50x128xf32>,
    return
  }
  func.func @transform_0(%arg0: i32) -> (i32, i32) {
    %c0_i32 = arith.constant 0 : i32
    %c0_i32_0 = arith.constant 0 : i32
    return %arg0, %c0_i32 : i32, i32
  }
  func.func @transform_1(%arg0: i32) -> (i32, i32) {
    %c0_i32 = arith.constant 0 : i32
    %c0_i32_0 = arith.constant 0 : i32
    return %arg0, %c0_i32 : i32, i32
  }
  func.func @transform_2(%arg0: i32) -> (i32, i32) {
    %c0_i32 = arith.constant 0 : i32
    %c0_i32_0 = arith.constant 0 : i32
    return %arg0, %c0_i32 : i32, i32
  }
}

</mosaic_0001>

<bundles_post_ra>
// kernel: positional_encoding_forward.1
= control target key start
LH: loop header
LB: loop body
LE: loop exit
PB: predicated region body
PF: predicated region fallthrough
CT: control target
= control target key end

     0   :  { %7 = vsyncpa [#allocation3], 0  ;;  %s228_s0 = inlined_call_operand.hbm [shape: f32[50,128], index: 0, kind: input, shape index: {}, may-alias: {0,2}]   ;;  %s229_s1 = inlined_call_operand.hbm [shape: f32[50,128], index: 1, kind: input, shape index: {}]   ;;  %s230_s2 = inlined_call_operand.hbm [shape: f32[50,128], index: 2, kind: output, shape index: {}, may-alias: {0,2}]  }
   0x1   :  { %8 = vsyncpa [#allocation6], 0 }
   0x2   :  { %9 = vsyncpa [#allocation4], 0  ;;  %s163_s9 = smov [#allocation2]   ;;  %s91_s13 = scalar_lea.hbm %s228_s0, 896 }
   0x3   :  { %s15_s10 = sshll.u32 %s163_s9, 4  ;;  %p92_p0 = scmp.ne.s32.totalorder %s228_s0, %s91_s13  ;;  %s16_s10 = int_to_ptr.vmem [resolvable:$true] %s15_s10 }
   0x4   :  { %p95_p1 = scmp.lt.u32.totalorder %s91_s13, %s228_s0 }
   0x6   :  { %p97_p2 = pnand %p95_p1, %p92_p0 }
   0x8   :  { %100 = shalt.err (!%p97_p2)
}
   0x9   :  { %s101_s18 = scalar_lea.vmem %s16_s10, 896  ;;  %p106_p4 = scmp.lt.s32.totalorder %s16_s10, %s16_s10 }
   0xa   :  { %p102_p3 = scmp.ne.s32.totalorder %s16_s10, %s101_s18  ;;  %p107_p5 = scmp.lt.s32.totalorder %s101_s18, %s101_s18 }
   0xc   :  { %p108_p6 = por %p107_p5, %p106_p4 }
   0xe   :  { %p109_p7 = pnand %p108_p6, %p102_p3 }
  0x10   :  { %112 = shalt.err (!%p109_p7)
}
  0x11   :  { %s164_s19 = smov 128   ;;  %s165_s20 = smov 8  }
  0x12   :  { %21 = dma.hbm_to_vmem [thread:$0]  %s228_s0, 896, %s16_s10, [#allocation3], %s164_s19, %s164_s19, %s165_s20  }
  0x13   :  { %s166_s23 = smov [#allocation5]   ;;  %s113_s27 = scalar_lea.hbm %s229_s1, 896 }
  0x14   :  { %s27_s24 = sshll.u32 %s166_s23, 4  ;;  %p114_p8 = scmp.ne.s32.totalorder %s229_s1, %s113_s27  ;;  %s28_s24 = int_to_ptr.vmem [resolvable:$true] %s27_s24 }
  0x15   :  { %p117_p9 = scmp.lt.u32.totalorder %s113_s27, %s229_s1 }
  0x17   :  { %p119_p10 = pnand %p117_p9, %p114_p8 }
  0x19   :  { %122 = shalt.err (!%p119_p10)
}
  0x1a   :  { %s123_s4 = scalar_lea.vmem %s28_s24, 896  ;;  %p128_p12 = scmp.lt.s32.totalorder %s28_s24, %s28_s24 }
  0x1b   :  { %p124_p11 = scmp.ne.s32.totalorder %s28_s24, %s123_s4  ;;  %p129_p13 = scmp.lt.s32.totalorder %s123_s4, %s123_s4 }
  0x1d   :  { %p130_p0 = por %p129_p13, %p128_p12 }
  0x1f   :  { %p131_p1 = pnand %p130_p0, %p124_p11 }
  0x21   :  { %134 = shalt.err (!%p131_p1)
}
  0x22   :  { %33 = dma.hbm_to_vmem [thread:$0]  %s229_s1, 896, %s28_s24, [#allocation6], %s164_s19, %s164_s19, %s165_s20  }
  0x23   :  { %157 = dma.done.wait [#allocation3], 896  }
  0x24   :  { %158 = vsyncadd [#allocation3], 4294966400 }
  0x25   :  { %159 = dma.done.wait [#allocation6], 896  }
  0x26   :  { %160 = vsyncadd [#allocation6], 4294966400  ;;  %v40_v0 = vld [vmem:[#allocation2] sm:$0xff]  ;;  %v47_v1 = vld [vmem:[#allocation5] sm:$0xff]  ;;  %s167_s6 = smov [#allocation7]  }
  0x27   :  { %v41_v2 = vld [vmem:[#allocation2 + $0x8] sm:$0xff]  ;;  %v54_v3 = vadd.f32 %v47_v1, %v40_v0  ;;  %v48_v4 = vld [vmem:[#allocation5 + $0x8] sm:$0xff]  ;;  %v42_v5 = vld [vmem:[#allocation2 + $0x10] sm:$0xff]  ;;  %s73_s7 = sshll.u32 %s167_s6, 4  ;;  %s74_s7 = int_to_ptr.vmem [resolvable:$true] %s73_s7 }
  0x28   :  { %v49_v6 = vld [vmem:[#allocation5 + $0x10] sm:$0xff]  ;;  %v55_v7 = vadd.f32 %v48_v4, %v41_v2  ;;  %v43_v9 = vld [vmem:[#allocation2 + $0x18] sm:$0xff]  ;;  %v50_v10 = vld [vmem:[#allocation5 + $0x18] sm:$0xff]  ;;  %s135_s1 = scalar_lea.vmem %s74_s7, 896  ;;  %p140_p3 = scmp.lt.s32.totalorder %s74_s7, %s74_s7 }
  0x29   :  { %v56_v8 = vadd.f32 %v49_v6, %v42_v5  ;;  %v44_v11 = vld [vmem:[#allocation2 + $0x20] sm:$0xff]  ;;  %61 = vst [vmem:[#allocation7] sm:$0xff] %v54_v3  ;;  %v57_v12 = vadd.f32 %v50_v10, %v43_v9  ;;  %v51_v13 = vld [vmem:[#allocation5 + $0x20] sm:$0xff]  ;;  %v45_v14 = vld [vmem:[#allocation2 + $0x28] sm:$0xff]  ;;  %p136_p2 = scmp.ne.s32.totalorder %s74_s7, %s135_s1  ;;  %p141_p4 = scmp.lt.s32.totalorder %s135_s1, %s135_s1 }
  0x2a   :  { %v52_v15 = vld [vmem:[#allocation5 + $0x28] sm:$0xff]  ;;  %62 = vst [vmem:[#allocation7 + $0x8] sm:$0xff] %v55_v7  ;;  %v58_v16 = vadd.f32 %v51_v13, %v44_v11  ;;  %v46_v18 = vld [vmem:[#allocation2 + $0x30] sm:$0x3]  ;;  %v53_v19 = vld [vmem:[#allocation5 + $0x30] sm:$0x3] }
  0x2b   :  { %63 = vst [vmem:[#allocation7 + $0x10] sm:$0xff] %v56_v8  ;;  %v59_v17 = vadd.f32 %v52_v15, %v45_v14  ;;  %64 = vst [vmem:[#allocation7 + $0x18] sm:$0xff] %v57_v12  ;;  %v60_v20 = vadd.f32 %v53_v19, %v46_v18  ;;  %p142_p5 = por %p141_p4, %p140_p3 }
  0x2c   :  { %65 = vst [vmem:[#allocation7 + $0x20] sm:$0xff] %v58_v16 }
  0x2d   :  { %66 = vst [vmem:[#allocation7 + $0x28] sm:$0xff] %v59_v17  ;;  %67 = vst [vmem:[#allocation7 + $0x30] sm:$0x3] %v60_v20  ;;  %p143_p6 = pnand %p142_p5, %p136_p2 }
  0x2f   :  { %146 = shalt.err (!%p143_p6)
}
  0x30   :  { %s147_s10 = scalar_lea.hbm %s230_s2, 896 }
  0x31   :  { %p148_p7 = scmp.ne.s32.totalorder %s230_s2, %s147_s10  ;;  %p151_p8 = scmp.lt.u32.totalorder %s147_s10, %s230_s2 }
  0x33   :  { %p153_p9 = pnand %p151_p8, %p148_p7 }
  0x35   :  { %156 = shalt.err (!%p153_p9)
}
  0x36   :  { %79 = dma.vmem_to_hbm [thread:$0]  %s74_s7, 896, %s230_s2, [#allocation4], %s164_s19, %s164_s19, %s165_s20  }
  0x37   :  { %161 = dma.done.wait [#allocation4], 896  }
  0x38   :  { %162 = vsyncadd [#allocation4], 4294966400 }
  0x39   :  { %83 = vsyncpa [#allocation3], 1 }
  0x3a   :  { %84 = vsyncpa [#allocation6], 1 }
  0x3b   :  { %85 = vsyncpa [#allocation4], 1 }

</bundles_post_ra>
